<compile_context>
chip_gen: v7x
topology: tpu7x:2x2x1
jax: 0.10.0
libtpu: 0.0.40
codegen_flags: <defaults>
</compile_context>

<pallas_src>
import jax
import jax.numpy as jnp
from jax.experimental import pallas as pl
from jax.experimental.pallas import tpu as pltpu


# ----------------------------- Pallas kernel ------------------------------ #

def cross_attention_kernel(x_ref, ctx_ref,
                           wq_ref, bq_ref,       # folded proj_in @ Wq * scale  : [E,Cin], [E,1]
                           wk_ref, bk_ref,       # Wk                           : [E,E],   [1,E]
                           wv_ref, bv_ref,       # folded Wv @ proj_out (+bias) : [Cin,E], [Cin,1]
                           o_ref):
    """One batch element.

    x_ref   : [1, Cin, Nq]  natural NCHW flattening (channels on sublanes, pixels on lanes)
    ctx_ref : [1, Nk, E]    context rows
    o_ref   : [1, Cin, Nq]  y^T  (reshapes directly to NCHW outside)
    """
    x_t = x_ref[0]        # [Cin, Nq]
    ctx = ctx_ref[0]      # [Nk, E]

    # Q^T = (W_in @ Wq * scale)^T @ x^T + bias  -> [E, Nq]  (lane-dense, scale pre-folded)
    q_t = jnp.dot(wq_ref[...], x_t, preferred_element_type=jnp.float32) + bq_ref[...]

    # K = ctx @ Wk + bk  -> [Nk, E]
    k = jnp.dot(ctx, wk_ref[...], preferred_element_type=jnp.float32) + bk_ref[...]

    # attention logits, transposed: att_t[j, i] = scale * <q_i, k_j>  -> [Nk, Nq]
    att_t = jnp.dot(k, q_t, preferred_element_type=jnp.float32)
    # TODO(synk): pad_mask (masked_fill with -1e9) not wired in; forward is used with pad_mask=None.

    # softmax over the key axis (axis 0 in this transposed layout)
    att_t = att_t - jnp.max(att_t, axis=0, keepdims=True)
    p = jnp.exp(att_t)
    p = p * pl.reciprocal(jnp.sum(p, axis=0, keepdims=True), approx=True)   # [Nk, Nq]

    # V'^T = (Wv @ W_out)^T @ ctx^T + (bv @ W_out + b_out)^T  -> [Cin, Nk]
    # (contraction on last dims of both operands: no explicit transpose materialized)
    v_t = jnp.einsum('ce,je->cj', wv_ref[...], ctx,
                     preferred_element_type=jnp.float32) + bv_ref[...]

    # y^T = V'^T @ P^T  -> [Cin, Nq]   (b_out already folded into V' because softmax rows sum to 1)
    o_ref[0] = jnp.dot(v_t, p, preferred_element_type=jnp.float32).astype(o_ref.dtype)


# ------------------------------ host wrapper ------------------------------ #

@jax.jit
def cross_attention_pallas(x, context, params):
    B, Cin, H, W = x.shape
    _, E, Hc, Wc = context.shape
    Nq = H * W
    Nk = Hc * Wc
    scale = float(E) ** (-0.5)

    w_in, b_in, wq, bq, wk, bk, wv, bv, w_out, b_out = params

    # Fold proj_in + scale into the Q projection, and proj_out (+ its bias) into V.
    # These are tiny one-time host matmuls over [Cin,E]/[E,E]-sized tensors.
    w_q_t = ((w_in @ wq) * scale).T          # [E, Cin]
    b_q_c = ((b_in @ wq + bq) * scale).T     # [E, 1]
    w_v_t = (wv @ w_out).T                   # [Cin, E]
    b_v_c = (bv @ w_out + b_out).T           # [Cin, 1]

    # x stays in its natural NCHW flattening (just a reshape); context becomes rows [B, Nk, E]
    # (a tiny transpose). The kernel output is y^T, which reshapes straight back to NCHW.
    x_t = x.reshape(B, Cin, Nq)
    ctx = jnp.transpose(context.reshape(B, E, Nk), (0, 2, 1))

    y_t = pl.pallas_call(
        cross_attention_kernel,
        out_shape=jax.ShapeDtypeStruct((B, Cin, Nq), jnp.float32),
        grid_spec=pltpu.PrefetchScalarGridSpec(
            num_scalar_prefetch=0,
            grid=(B,),
            in_specs=[
                pl.BlockSpec((1, Cin, Nq), lambda b: (b, 0, 0)),   # x (channels-first)
                pl.BlockSpec((1, Nk, E), lambda b: (b, 0, 0)),     # context rows
                pl.BlockSpec((E, Cin), lambda b: (0, 0)),          # w_q_t  (resident)
                pl.BlockSpec((E, 1), lambda b: (0, 0)),            # b_q_c
                pl.BlockSpec((E, E), lambda b: (0, 0)),            # wk
                pl.BlockSpec((1, E), lambda b: (0, 0)),            # bk
                pl.BlockSpec((Cin, E), lambda b: (0, 0)),          # w_v_t
                pl.BlockSpec((Cin, 1), lambda b: (0, 0)),          # b_v_c
            ],
            out_specs=pl.BlockSpec((1, Cin, Nq), lambda b: (b, 0, 0)),
        ),
        compiler_params=pltpu.CompilerParams(
            dimension_semantics=("parallel",)),   # B=2 shards across v7x's two TensorCores
    )(x_t, ctx, w_q_t, b_q_c, wk, bk, w_v_t, b_v_c)

    # [B, Cin, Nq] IS NCHW once reshaped — no output transpose needed.
    return y_t.reshape(B, Cin, H, W)


# ------------------------- pure-JAX reference ----------------------------- #

def cross_attention_ref(x, context, params):
    B, Cin, H, W = x.shape
    _, E, Hc, Wc = context.shape
    scale = float(E) ** (-0.5)
    w_in, b_in, wq, bq, wk, bk, wv, bv, w_out, b_out = params

    x_flat = jnp.transpose(x, (0, 2, 3, 1)).reshape(B, H * W, Cin)
    ctx_flat = jnp.transpose(context.reshape(B, E, Hc * Wc), (0, 2, 1))

    xp = x_flat @ w_in + b_in
    q = xp @ wq + bq
    k = ctx_flat @ wk + bk
    v = ctx_flat @ wv + bv
    att = jnp.einsum('bid,bjd->bij', q, k) * scale
    att = jax.nn.softmax(att, axis=-1)
    out = jnp.einsum('bij,bjd->bid', att, v)
    y = out @ w_out + b_out
    return jnp.transpose(y.reshape(B, H, W, Cin), (0, 3, 1, 2))


# --------------------------------- main ------------------------------------ #

def init_params(key, in_channels, emb_dim):
    ks = jax.random.split(key, 10)
    s = 0.05
    w_in = s * jax.random.normal(ks[0], (in_channels, emb_dim), jnp.float32)
    b_in = s * jax.random.normal(ks[1], (1, emb_dim), jnp.float32)
    wq = s * jax.random.normal(ks[2], (emb_dim, emb_dim), jnp.float32)
    bq = s * jax.random.normal(ks[3], (1, emb_dim), jnp.float32)
    wk = s * jax.random.normal(ks[4], (emb_dim, emb_dim), jnp.float32)
    bk = s * jax.random.normal(ks[5], (1, emb_dim), jnp.float32)
    wv = s * jax.random.normal(ks[6], (emb_dim, emb_dim), jnp.float32)
    bv = s * jax.random.normal(ks[7], (1, emb_dim), jnp.float32)
    w_out = s * jax.random.normal(ks[8], (emb_dim, in_channels), jnp.float32)
    b_out = s * jax.random.normal(ks[9], (1, in_channels), jnp.float32)
    return (w_in, b_in, wq, bq, wk, bk, wv, bv, w_out, b_out)


if __name__ == "__main__":
    key = jax.random.PRNGKey(0)
    k_x, k_ctx, k_p = jax.random.split(key, 3)

    B, Cin, H, W = 2, 4, 16, 16      # x: [B, in_channels, H, W]
    E, Hc, Wc = 32, 4, 2             # context: [B, emb_dim, Hc, Wc] -> seq_len = 8

    x = jax.random.normal(k_x, (B, Cin, H, W), jnp.float32)
    context = jax.random.normal(k_ctx, (B, E, Hc, Wc), jnp.float32)
    params = init_params(k_p, Cin, E)

    y = jax.block_until_ready(cross_attention_pallas(x, context, params))
    y_ref = jax.block_until_ready(cross_attention_ref(x, context, params))

    assert y.shape == (B, Cin, H, W)
    assert jnp.allclose(y, y_ref, rtol=1e-3, atol=1e-3), "mismatch vs JAX reference"
    print("KERNEL_OK")
</pallas_src>

<mosaic_0001>
module attributes {stable_mosaic.version = 11 : i64} {
  func.func @cross_attention_kernel(%arg0: i32, %arg1: memref<1x4x256xf32, #tpu.memory_space<vmem>>, %arg2: memref<1x8x32xf32, #tpu.memory_space<vmem>>, %arg3: memref<32x4xf32, #tpu.memory_space<vmem>>, %arg4: memref<32x1xf32, #tpu.memory_space<vmem>>, %arg5: memref<32x32xf32, #tpu.memory_space<vmem>>, %arg6: memref<1x32xf32, #tpu.memory_space<vmem>>, %arg7: memref<4x32xf32, #tpu.memory_space<vmem>>, %arg8: memref<4x1xf32, #tpu.memory_space<vmem>>, %arg9: memref<1x4x256xf32, #tpu.memory_space<vmem>>) attributes {dimension_semantics = [#tpu.dimension_semantics<parallel>], iteration_bounds = array<i64: 2>, scalar_prefetch = 0 : i64, scratch_operands = 0 : i64, tpu.core_type = #tpu.core_type<tc>, window_params = [{transform_indices = @transform_0, window_bounds = array<i64: 1, 4, 256>}, {transform_indices = @transform_1, window_bounds = array<i64: 1, 8, 32>}, {pipeline_mode = #tpu.pipeline_mode<synchronous>, transform_indices = @transform_2, window_bounds = array<i64: 32, 4>}, {pipeline_mode = #tpu.pipeline_mode<synchronous>, transform_indices = @transform_3, window_bounds = array<i64: 32, 1>}, {pipeline_mode = #tpu.pipeline_mode<synchronous>, transform_indices = @transform_4, window_bounds = array<i64: 32, 32>}, {pipeline_mode = #tpu.pipeline_mode<synchronous>, transform_indices = @transform_5, window_bounds = array<i64: 1, 32>}, {pipeline_mode = #tpu.pipeline_mode<synchronous>, transform_indices = @transform_6, window_bounds = array<i64: 4, 32>}, {pipeline_mode = #tpu.pipeline_mode<synchronous>, transform_indices = @transform_7, window_bounds = array<i64: 4, 1>}, {transform_indices = @transform_8, window_bounds = array<i64: 1, 4, 256>}]} {
    %c0 = arith.constant 0 : index
    %c0_0 = arith.constant 0 : index
    %c0_1 = arith.constant 0 : index
    %0 = vector.load %arg1[%c0, %c0_0, %c0_1] : memref<1x4x256xf32, #tpu.memory_space<vmem>>, vector<1x4x256xf32>
    %1 = vector.shape_cast %0 : vector<1x4x256xf32> to vector<4x256xf32>
    %c0_2 = arith.constant 0 : index
    %c0_3 = arith.constant 0 : index
    %c0_4 = arith.constant 0 : index
    %2 = vector.load %arg2[%c0_2, %c0_3, %c0_4] : memref<1x8x32xf32, #tpu.memory_space<vmem>>, vector<1x8x32xf32>
    %3 = vector.shape_cast %2 : vector<1x8x32xf32> to vector<8x32xf32>
    %c0_5 = arith.constant 0 : index
    %c0_6 = arith.constant 0 : index
    %4 = vector.load %arg3[%c0_5, %c0_6] : memref<32x4xf32, #tpu.memory_space<vmem>>, vector<32x4xf32>
    %cst = arith.constant dense<0.000000e+00> : vector<32x256xf32>
    %5 = tpu.matmul %4, %1, %cst {dimension_numbers = #tpu.dot_dimension_numbers<[1], [0], [0], [1], [0, 0, 1, 1], [], []>} : vector<32x4xf32>, vector<4x256xf32>, vector<32x256xf32> -> vector<32x256xf32>
    %c0_7 = arith.constant 0 : index
    %c0_8 = arith.constant 0 : index
    %6 = vector.load %arg4[%c0_7, %c0_8] : memref<32x1xf32, #tpu.memory_space<vmem>>, vector<32x1xf32>
    %7 = vector.broadcast %6 : vector<32x1xf32> to vector<32x256xf32>
    %8 = arith.addf %5, %7 : vector<32x256xf32>
    %c0_9 = arith.constant 0 : index
    %c0_10 = arith.constant 0 : index
    %9 = vector.load %arg5[%c0_9, %c0_10] : memref<32x32xf32, #tpu.memory_space<vmem>>, vector<32x32xf32>
    %cst_11 = arith.constant dense<0.000000e+00> : vector<8x32xf32>
    %10 = tpu.matmul %3, %9, %cst_11 {dimension_numbers = #tpu.dot_dimension_numbers<[1], [0], [0], [1], [0, 0, 1, 1], [], []>} : vector<8x32xf32>, vector<32x32xf32>, vector<8x32xf32> -> vector<8x32xf32>
    %c0_12 = arith.constant 0 : index
    %c0_13 = arith.constant 0 : index
    %11 = vector.load %arg6[%c0_12, %c0_13] : memref<1x32xf32, #tpu.memory_space<vmem>>, vector<1x32xf32>
    %12 = vector.broadcast %11 : vector<1x32xf32> to vector<8x32xf32>
    %13 = arith.addf %10, %12 : vector<8x32xf32>
    %cst_14 = arith.constant dense<0.000000e+00> : vector<8x256xf32>
    %14 = tpu.matmul %13, %8, %cst_14 {dimension_numbers = #tpu.dot_dimension_numbers<[1], [0], [0], [1], [0, 0, 1, 1], [], []>} : vector<8x32xf32>, vector<32x256xf32>, vector<8x256xf32> -> vector<8x256xf32>
    %cst_15 = arith.constant dense<0xFF800000> : vector<256xf32>
    %15 = vector.multi_reduction <maximumf>, %14, %cst_15 [0] : vector<8x256xf32> to vector<256xf32>
    %16 = vector.shape_cast %15 : vector<256xf32> to vector<1x256xf32>
    %17 = vector.broadcast %16 : vector<1x256xf32> to vector<8x256xf32>
    %18 = arith.subf %14, %17 : vector<8x256xf32>
    %19 = math.exp %18 : vector<8x256xf32>
    %cst_16 = arith.constant dense<0.000000e+00> : vector<256xf32>
    %20 = vector.multi_reduction <add>, %19, %cst_16 [0] : vector<8x256xf32> to vector<256xf32>
    %21 = vector.shape_cast %20 : vector<256xf32> to vector<1x256xf32>
    %22 = tpu.reciprocal %21 {approx = true} : vector<1x256xf32> -> vector<1x256xf32>
    %23 = vector.broadcast %22 : vector<1x256xf32> to vector<8x256xf32>
    %24 = arith.mulf %19, %23 : vector<8x256xf32>
    %c0_17 = arith.constant 0 : index
    %c0_18 = arith.constant 0 : index
    %25 = vector.load %arg7[%c0_17, %c0_18] : memref<4x32xf32, #tpu.memory_space<vmem>>, vector<4x32xf32>
    "tpu.trace_start"() <{level = 10 : i32, message = "ce,je->cj"}> : () -> ()
    %cst_19 = arith.constant dense<0.000000e+00> : vector<4x8xf32>
    %26 = tpu.matmul %25, %3, %cst_19 {dimension_numbers = #tpu.dot_dimension_numbers<[1], [1], [0], [0], [0, 0, 1, 0], [], []>} : vector<4x32xf32>, vector<8x32xf32>, vector<4x8xf32> -> vector<4x8xf32>
    "tpu.trace_stop"() : () -> ()
    %c0_20 = arith.constant 0 : index
    %c0_21 = arith.constant 0 : index
    %27 = vector.load %arg8[%c0_20, %c0_21] : memref<4x1xf32, #tpu.memory_space<vmem>>, vector<4x1xf32>
    %28 = vector.broadcast %27 : vector<4x1xf32> to vector<4x8xf32>
    %29 = arith.addf %26, %28 : vector<4x8xf32>
    %cst_22 = arith.constant dense<0.000000e+00> : vector<4x256xf32>
    %30 = tpu.matmul %29, %24, %cst_22 {dimension_numbers = #tpu.dot_dimension_numbers<[1], [0], [0], [1], [0, 0, 1, 1], [], []>} : vector<4x8xf32>, vector<8x256xf32>, vector<4x256xf32> -> vector<4x256xf32>
    %c0_23 = arith.constant 0 : index
    %c0_24 = arith.constant 0 : index
    %c0_25 = arith.constant 0 : index
    %31 = vector.load %arg9[%c0_23, %c0_24, %c0_25] : memref<1x4x256xf32, #tpu.memory_space<vmem>>, vector<1x4x256xf32>
    %32 = vector.shape_cast %31 : vector<1x4x256xf32> to vector<4x256xf32>
    %33 = vector.shape_cast %30 : vector<4x256xf32> to vector<1x4x256xf32>
    tpu.vector_store %arg9[%c0_23, %c0_24, %c0_25], %33 {strides = array<i32>} : memref<1x4x256xf32, #tpu.memory_space<vmem>>, vector<1x4x256xf32>,
    return
  }
  func.func @transform_0(%arg0: i32) -> (i32, i32, i32) {
    %c0_i32 = arith.constant 0 : i32
    %c0_i32_0 = arith.constant 0 : i32
    %c0_i32_1 = arith.constant 0 : i32
    return %arg0, %c0_i32, %c0_i32_0 : i32, i32, i32
  }
  func.func @transform_1(%arg0: i32) -> (i32, i32, i32) {
    %c0_i32 = arith.constant 0 : i32
    %c0_i32_0 = arith.constant 0 : i32
    %c0_i32_1 = arith.constant 0 : i32
    return %arg0, %c0_i32, %c0_i32_0 : i32, i32, i32
  }
  func.func @transform_2(%arg0: i32) -> (i32, i32) {
    %c0_i32 = arith.constant 0 : i32
    %c0_i32_0 = arith.constant 0 : i32
    %c0_i32_1 = arith.constant 0 : i32
    return %c0_i32, %c0_i32_0 : i32, i32
  }
  func.func @transform_3(%arg0: i32) -> (i32, i32) {
    %c0_i32 = arith.constant 0 : i32
    %c0_i32_0 = arith.constant 0 : i32
    %c0_i32_1 = arith.constant 0 : i32
    return %c0_i32, %c0_i32_0 : i32, i32
  }
  func.func @transform_4(%arg0: i32) -> (i32, i32) {
    %c0_i32 = arith.constant 0 : i32
    %c0_i32_0 = arith.constant 0 : i32
    %c0_i32_1 = arith.constant 0 : i32
    return %c0_i32, %c0_i32_0 : i32, i32
  }
  func.func @transform_5(%arg0: i32) -> (i32, i32) {
    %c0_i32 = arith.constant 0 : i32
    %c0_i32_0 = arith.constant 0 : i32
    %c0_i32_1 = arith.constant 0 : i32
    return %c0_i32, %c0_i32_0 : i32, i32
  }
  func.func @transform_6(%arg0: i32) -> (i32, i32) {
    %c0_i32 = arith.constant 0 : i32
    %c0_i32_0 = arith.constant 0 : i32
    %c0_i32_1 = arith.constant 0 : i32
    return %c0_i32, %c0_i32_0 : i32, i32
  }
  func.func @transform_7(%arg0: i32) -> (i32, i32) {
    %c0_i32 = arith.constant 0 : i32
    %c0_i32_0 = arith.constant 0 : i32
    %c0_i32_1 = arith.constant 0 : i32
    return %c0_i32, %c0_i32_0 : i32, i32
  }
  func.func @transform_8(%arg0: i32) -> (i32, i32, i32) {
    %c0_i32 = arith.constant 0 : i32
    %c0_i32_0 = arith.constant 0 : i32
    %c0_i32_1 = arith.constant 0 : i32
    return %arg0, %c0_i32, %c0_i32_0 : i32, i32, i32
  }
}

</mosaic_0001>

<bundles_post_ra>
// kernel: cross_attention_pallas.1
= control target key start
LH: loop header
LB: loop body
LE: loop exit
PB: predicated region body
PF: predicated region fallthrough
CT: control target
= control target key end

     0   :  { %s1025_s27 = smov 0   ;;  %s1114_s0 = inlined_call_operand.vmem [shape: f32[2,4,256], index: 0, kind: input, shape index: {}]   ;;  %s1115_s1 = inlined_call_operand.vmem [shape: f32[2,8,32], index: 1, kind: input, shape index: {}]   ;;  %s1116_s2 = inlined_call_operand.vmem [shape: f32[32,4], index: 2, kind: input, shape index: {}]   ;;  %s1117_s3 = inlined_call_operand.vmem [shape: f32[32,1], index: 3, kind: input, shape index: {}]   ;;  %s1118_s4 = inlined_call_operand.vmem [shape: f32[32,32], index: 4, kind: input, shape index: {}]   ;;  %s1119_s5 = inlined_call_operand.vmem [shape: f32[1,32], index: 5, kind: input, shape index: {}]   ;;  %s1120_s6 = inlined_call_operand.vmem [shape: f32[4,32], index: 6, kind: input, shape index: {}]   ;;  %s1121_s7 = inlined_call_operand.vmem [shape: f32[4,1], index: 7, kind: input, shape index: {}]   ;;  %s1122_s8 = inlined_call_operand.vmem [shape: f32[2,4,256], index: 8, kind: output, shape index: {}]  }
   0x1 LB: > { %s882_s28 = sadd.s32 4294967295, %s974_s27   ;;  %p886_p0 = scmp.ge.s32.totalorder %s974_s27, 1  ;;  %s974_s27 = sphi %s1025_s27, %s18_s27  }
   0x2   : > { %p271_p1 = scmp.lt.s32.totalorder %s974_s27, 3 }
   0x4   : > { %p272_p2 = pnand %p886_p0, %p271_p1 }
   0x5   : > { %p309_p3 = scmp.lt.s32.totalorder (!%p272_p2), %s882_s28, 1  ;;  %v976_v0 = vmov (!%p272_p2), 0.0   ;;  %v462_v1 = vld [vmem:[%s1118_s4] sm:$0xff] (!%p272_p2)  ;;  %v463_v2 = vld [vmem:[%s1118_s4 + $0x8] sm:$0xff] (!%p272_p2)  ;;  %v977_v3 = vmov (!%p272_p2), 0.0|0.0   ;;  %v464_v5 = vld [vmem:[%s1118_s4 + $0x10] sm:$0xff] (!%p272_p2) }
   0x6   : > { %275 = sbr.rel (%p272_p2) target bundleno = 737 (0x2e1), region = 52  ;;  %437 = vmatprep.mubr.f32.mxu0 (!%p272_p2), %v976_v0  ;;  %931 = vmatprep.subr.bf16.mxu1 (!%p272_p2), %v977_v3  ;;  %v932_v4 = vpack.c.bf16 (!%p272_p2), %v463_v2, %v462_v1  ;;  %v465_v6 = vld [vmem:[%s1118_s4 + $0x18] sm:$0xff] (!%p272_p2)  ;;  %vm978_vm0 = vmmov (!%p272_p2), 0   ;;  %v979_v7 = vmov (!%p272_p2), 0   ;;  %v329_v8 = vld [vmem:[%s1117_s3] sm:$0xff] (!%p272_p2)  ;;  %v331_v10 = vld [vmem:[%s1117_s3 + $0x10] sm:$0xff] (!%p272_p2) }
   0x7   : > { %923 = vmatprep.mubr.msk.f32.mxu1 (!%p272_p2), %vm978_vm0, %v976_v0  ;;  %957 = vset.pattern.permute.xlu0 (!%p272_p2), %v979_v7  ;;  %v935_v9 = vpack.c.bf16 (!%p272_p2), %v465_v6, %v464_v5  ;;  %v330_v11 = vld [vmem:[%s1117_s3 + $0x8] sm:$0xff] (!%p272_p2)  ;;  %vm368_vm1 = vcmask (!%p272_p2), 1043456   ;;  %v332_v13 = vld [vmem:[%s1117_s3 + $0x18] sm:$0xff] (!%p272_p2)  ;;  %v325_v15 = vld [vmem:[%s1116_s2] sm:$0xff] (!%p272_p2)  ;;  %vm355_vm2 = vcmask (!%p272_p2), 31744   ;;  %vm473_vm3 = vcmask (!%p272_p2), 261120  }
   0x8   : > { %958 = vset.pattern.permute.xlu1 (!%p272_p2), %v979_v7  ;;  %933 = vmatpush3.bf16.msra.mxu1 (!%p272_p2), %v932_v4  ;;  %v656_v16 = vld [vmem:[%s1121_s7] sm:$0xf] (!%p272_p2)  ;;  %v326_v18 = vld [vmem:[%s1116_s2 + $0x8] sm:$0xff] (!%p272_p2)  ;;  %v327_v19 = vld [vmem:[%s1116_s2 + $0x10] sm:$0xff] (!%p272_p2)  ;;  %vm735_vm4 = vcmask (!%p272_p2), 64512  }
   0x9   : > { %335 = vperm.xlu0 (!%p272_p2), %957, %v329_v8   ;;  %934 = vmatprep.subr.bf16.mxu1 (!%p272_p2), %v977_v3  ;;  %v328_v20 = vld [vmem:[%s1116_s2 + $0x18] sm:$0xff] (!%p272_p2)  ;;  %v655_v21 = vld [vmem:[%s1120_s6] sm:$0xf] (!%p272_p2) }
   0xa   : > { %345 = vperm.xlu1 (!%p272_p2), %958, %v331_v10   ;;  %v898_v47 = vld [vmem:[%s1119_s5] ss:$0 sm:$0xff] (!%p272_p2) }
   0xc   : > { %936 = vmatpush3.bf16.msra.mxu1 (!%p272_p2), %v935_v9 }
   0xd   : > { %s1124_s28 = smov (!%p309_p3, %s882_s28), 1  ;;  %340 = vperm.xlu0 %957, %v330_v11  }
   0xe   : > { %s1051_s17 = sshll.u32 %s1124_s28, 3  ;;  %350 = vperm.xlu1 %958, %v332_v13  }
   0xf   : > { %s313_s22 = scalar_lea.vmem %s1114_s0, %s1051_s17  ;;  %s317_s10 = scalar_lea.vmem %s1115_s1, %s1051_s17 }
  0x10   : > { %v323_v12 = vld [vmem:[%s313_s22] sm:$0xff]  ;;  %s322_s26 = scalar_lea.vmem %s1122_s8, %s1051_s17 }
  0x11   : > { %v354_v14 = vcombine.high %v323_v12, %v323_v12  ;;  %v324_v17 = vld [vmem:[%s317_s10] sm:$0xff]  ;;  %659 = vperm.xlu0 %957, %v656_v16  }
  0x12   : > { %924 = vmatmul.mubr.msk.f32.vlgmr.msra.gmra.mrb[0].mxu1 %vm473_vm3, %v324_v17 }
  0x13   : > { %892 = vmatprep.subr.msk.mxu0 %vm368_vm1, %v354_v14  ;;  %614 = vmatprep.mubr.f32.mxu1 %v976_v0 }
  0x14   : > { %893 = vmatpush1.msk.msra.mxu0 %vm368_vm1, %v323_v12 }
  0x15   : > { %894 = vmatmul.mubr.msk.f32.vlgmr.msra.gmra.mrb[0].mxu0 %vm355_vm2, %v325_v15  ;;  %926 = vmatprep.subr.mxu0 %v976_v0 }
  0x16   : > { %443 = vmatprep.mubr.f32.mxu0 %v976_v0 }
  0x19   : > { %895 = vmatmul.mubr.msk.f32.gmra.mrb[2].mxu0 %vm355_vm2, %v326_v18 }
  0x1a   : > { %449 = vmatprep.mubr.f32.mxu0 %v976_v0 }
  0x1b   : > { %927 = vmatpush3.xpose.msk.msra.mxu0 %vm473_vm3, %v324_v17 }
  0x1d   : > { %896 = vmatmul.mubr.msk.f32.gmra.mrb[4].mxu0 %vm355_vm2, %v327_v19 }
  0x1e   : > { %455 = vmatprep.mubr.f32.mxu0 %v976_v0 }
  0x21   : > { %897 = vmatmul.mubr.msk.f32.gmra.mrb[6].mxu0 %vm355_vm2, %v328_v20 }
  0x22   : > { %928 = vmatprep.mubr.msk.f32.mxu0 %vm978_vm0, %v976_v0 }
  0x25   : > { %929 = vmatmul.mubr.msk.f32.vlgmr.msra.gmra.mrb[8].mxu0 %vm473_vm3, %v655_v21 }
  0x88   : > { %v336_v22 = vpop.permute.xlu0 %335 }
  0x89   : > { %v346_v33 = vpop.permute.xlu1 %345 }
  0x8c   : > { %v341_v27 = vpop.permute.xlu0 %340 }
  0x8d   : > { %v351_v39 = vpop.permute.xlu1 %350 }
  0xe5   : > { %v543_v25 = vpop.f32.mrb[0].mxu1 }
  0xe6   : > { %v925_v26 = vpop.f32.mrb[1].mxu1  ;;  %v544_v51 = vadd.f32 %v898_v47, %v543_v25 }
  0xe8   : > { %v439_v23 = vpop.f32.mrb[0].mxu0 }
  0xe9   : > { %v441_v24 = vpop.f32.mrb[1].mxu0  ;;  %v440_v29 = vadd.f32 %v439_v23, %v336_v22  ;;  %v660_v23 = vpop.permute.xlu0 %659 }
  0xea   : > { %v442_v32 = vadd.f32 %v441_v24, %v336_v22 }
  0xec   : > { %v445_v28 = vpop.f32.mrb[2].mxu0 }
  0xed   : > { %v446_v30 = vadd.f32 %v445_v28, %v341_v27  ;;  %v447_v31 = vpop.f32.mrb[3].mxu0 }
  0xee   : > { %v448_v34 = vadd.f32 %v447_v31, %v341_v27 }
  0xef   : > { %v939_v35 = vpack.c.bf16 %v446_v30, %v440_v29 }
  0xf0   : > { %v937_v36 = vpack.c.bf16 %v448_v34, %v442_v32  ;;  %v451_v37 = vpop.f32.mrb[4].mxu0 }
  0xf1   : > { %v453_v38 = vpop.f32.mrb[5].mxu0  ;;  %v452_v41 = vadd.f32 %v451_v37, %v346_v33 }
  0xf2   : > { %938 = vmatprep.subr.bf16.mxu1 %v937_v36  ;;  %v454_v44 = vadd.f32 %v453_v38, %v346_v33 }
  0xf3   : > { %940 = vmatpush1.bf16.msra.mxu1 %v939_v35 }
  0xf4   : > { %v457_v40 = vpop.f32.mrb[6].mxu0 }
  0xf5   : > { %v458_v42 = vadd.f32 %v457_v40, %v351_v39  ;;  %v459_v43 = vpop.f32.mrb[7].mxu0 }
  0xf6   : > { %v460_v45 = vadd.f32 %v459_v43, %v351_v39 }
  0xf7   : > { %v943_v46 = vpack.c.bf16 %v458_v42, %v452_v41 }
  0xf8   : > { %v941_v48 = vpack.c.bf16 %v460_v45, %v454_v44  ;;  %v731_v49 = vpop.f32.mrb[8].mxu0 }
  0xf9   : > { %v930_v50 = vpop.f32.mrb[9].mxu0  ;;  %v732_v25 = vadd.f32 %v731_v49, %v660_v23 }
  0xfa   : > { %942 = vmatprep.subr.bf16.mxu1 %v941_v48 }
  0xfb   : > { %944 = vmatpush1.bf16.msra.mxu1 %v943_v46 }
  0xfe   : > { %900 = vmatmul.mubr.msk.f32.vlgmr.msra.gmra.mrb[2].mxu1 %vm473_vm3, %v544_v51 }
  0xff   : > { %803 = vmatprep.mubr.f32.mxu1 %v976_v0 }
 0x1d1   : > { %v616_v52 = vpop.f32.mrb[2].mxu1 }
 0x1d2   : > { %v621_v53 = vrot.slane %v616_v52, 4  ;;  %v618_v54 = vpop.f32.mrb[3].mxu1 }
 0x1d3   : > { %v627_v55 = vrot.slane %v618_v54, 4 }
 0x1d4   : > { %v622_v56 = vmax.f32 %v616_v52, %v621_v53 }
 0x1d5   : > { %v628_v57 = vmax.f32 %v618_v54, %v627_v55 }
 0x1d6   : > { %v623_v58 = vrot.slane %v622_v56, 2 }
 0x1d7   : > { %v629_v59 = vrot.slane %v628_v57, 2 }
 0x1d8   : > { %v624_v60 = vmax.f32 %v622_v56, %v623_v58 }
 0x1d9   : > { %v630_v61 = vmax.f32 %v628_v57, %v629_v59 }
 0x1da   : > { %v625_v62 = vrot.slane %v624_v60, 1 }
 0x1db   : > { %v631_v63 = vrot.slane %v630_v61, 1 }
 0x1dc   : > { %v626_v1 = vmax.f32 %v624_v60, %v625_v62 }
 0x1dd   : > { %v632_v2 = vmax.f32 %v630_v61, %v631_v63 }
 0x1de   : > { %v633_v3 = vsub.f32 %v616_v52, %v626_v1 }
 0x1df   : > { %v634_v4 = vsub.f32 %v618_v54, %v632_v2 }
 0x1e0   : > { %v635_v5 = vmul.f32 1.442695, %v633_v3 }
 0x1e1   : > { %v637_v6 = vmul.f32 1.442695, %v634_v4 }
 0x1e2   : > { %960 = vpow2.f32 %v635_v5 }
 0x1e3   : > { %962 = vpow2.f32 %v637_v6 }
 0x1ec   : > { %v961_v0 = vpop.eup %960 }
 0x1ed   : > { %v963_v7 = vpop.eup %962  ;;  %v639_v8 = vrot.slane %v961_v0, 4 }
 0x1ee   : > { %v645_v9 = vrot.slane %v963_v7, 4 }
 0x1ef   : > { %v640_v10 = vadd.f32 %v961_v0, %v639_v8 }
 0x1f0   : > { %v646_v11 = vadd.f32 %v963_v7, %v645_v9 }
 0x1f1   : > { %v641_v12 = vrot.slane %v640_v10, 2 }
 0x1f2   : > { %v647_v13 = vrot.slane %v646_v11, 2 }
 0x1f3   : > { %v642_v14 = vadd.f32 %v641_v12, %v640_v10 }
 0x1f4   : > { %v648_v15 = vadd.f32 %v647_v13, %v646_v11 }
 0x1f5   : > { %v643_v16 = vrot.slane %v642_v14, 1 }
 0x1f6   : > { %v649_v17 = vrot.slane %v648_v15, 1 }
 0x1f7   : > { %v644_v18 = vadd.f32 %v643_v16, %v642_v14 }
 0x1f8   : > { %v650_v19 = vadd.f32 %v649_v17, %v648_v15 }
 0x1f9   : > { %964 = vrcp.f32 %v644_v18 }
 0x1fa   : > { %966 = vrcp.f32 %v650_v19 }
 0x203   : > { %v965_v20 = vpop.eup %964 }
 0x204   : > { %v967_v21 = vpop.eup %966  ;;  %v653_v24 = vmul.f32 %v965_v20, %v961_v0 }
 0x205   : > { %v654_v22 = vmul.f32 %v967_v21, %v963_v7 }
 0x207   : > { %739 = vmatprep.subr.mxu1 %v654_v22 }
 0x208   : > { %740 = vmatpush1.msra.mxu1 %v653_v24 }
 0x209   : > { %903 = vmatmul.mubr.msk.f32.vlgmr.msra.gmra.mrb[4].mxu1 %vm735_vm4, %v732_v25 }
 0x2dc   : > { %v805_v26 = vpop.f32.mrb[4].mxu1 }
 0x2dd   : > { %v807_v27 = vpop.f32.mrb[5].mxu1 }
 0x2de   : > { %v812_v28 = vcombine.low %v805_v26, %v807_v27 }
 0x2e0   : > { %814 = vst [vmem:[%s322_s26] sm:$0xff] %v812_v28 }
 0x2e1 PF: > { %s18_s27 = sadd.s32 1, %s974_s27  }
 0x2e2   : > { %p15_p4 = scmp.ge.s32.totalorder %s18_s27, 4  }
 0x2e4   :  { %17 = sbr.rel (!%p15_p4) target bundleno = 1 (0x1), region = 85 }

</bundles_post_ra>
